<compile_context>
chip_gen: v7x
topology: tpu7x:2x2x1
jax: 0.10.0
libtpu: 0.0.40
codegen_flags: <defaults>
</compile_context>

<pallas_src>
import jax
import jax.numpy as jnp
from jax import lax
from jax.experimental import pallas as pl
from jax.experimental.pallas import tpu as pltpu


def _patch_embed_kernel(x_ref, w_ref, b_ref, o_ref):
    # x_ref: (TM, K) bf16 patch tile; w_ref: (K, TN) bf16 projection tile;
    # b_ref: (1, TN) f32 bias tile; o_ref: (TM, TN) output tile.
    acc = jnp.dot(x_ref[...], w_ref[...], preferred_element_type=jnp.float32)
    o_ref[...] = (acc + b_ref[...]).astype(o_ref.dtype)


def patch_embed_matmul(patches, w_flat, bias, *, block_m=1024, block_n=512,
                       out_dtype=jnp.float32):
    """patches: (M, K), w_flat: (K, N), bias: (N,) f32 -> (M, N) in out_dtype.
    N must be a multiple of 128 (caller pads)."""
    M, K = patches.shape
    _, N = w_flat.shape
    tm = M if M <= block_m else block_m          # full-M block for small inputs
    tn = N if N <= block_n else block_n          # full-N block keeps weight VMEM-resident
    grid_m = pl.cdiv(M, tm)
    grid_n = pl.cdiv(N, tn)

    cost = pl.CostEstimate(
        flops=2 * M * K * N,
        transcendentals=0,
        bytes_accessed=(patches.size * patches.dtype.itemsize
                        + w_flat.size * w_flat.dtype.itemsize
                        + M * N * jnp.dtype(out_dtype).itemsize),
    )

    return pl.pallas_call(
        _patch_embed_kernel,
        out_shape=jax.ShapeDtypeStruct((M, N), out_dtype),
        grid=(grid_m, grid_n),
        in_specs=[
            pl.BlockSpec((tm, K), lambda i, j: (i, 0)),   # activation: fetched once per i
            pl.BlockSpec((K, tn), lambda i, j: (0, j)),   # weight tile (resident if grid_n==1)
            pl.BlockSpec((1, tn), lambda i, j: (0, j)),   # bias tile
        ],
        out_specs=pl.BlockSpec((tm, tn), lambda i, j: (i, j)),
        compiler_params=pltpu.CompilerParams(
            dimension_semantics=("parallel", "parallel"),  # megacore sharding on v7x
            vmem_limit_bytes=32 * 1024 * 1024,
        ),
        cost_estimate=cost,
    )(patches, w_flat, bias.reshape(1, N))


def patch_embed(x, conv_w, conv_b, patch_size, *,
                compute_dtype=jnp.bfloat16, block_m=1024, block_n=512):
    """x: (B, C, H, W) NCHW; conv_w: (embed_dim, C, P, P); conv_b: (embed_dim,)
    Returns (B, H//P, W//P, embed_dim) == Conv2d(k=s=P) + Rearrange('b c h w -> b h w c')."""
    B, C, H, W = x.shape
    P = patch_size
    E = conv_w.shape[0]
    Hp, Wp = H // P, W // P
    K = C * P * P

    # Patch extraction (im2col): pure data movement; XLA fuses transpose+reshape+cast into
    # one pass that writes the bf16 patch matrix the kernel then streams from HBM.
    # TODO(synk): fold this rearrangement into the kernel (BlockSpec stripes of raw NCHW x
    # + in-kernel relayout) to save one HBM round trip of the activation; the required
    # lane-splitting reshape/transpose of (C, P, W) tiles has no reliable Mosaic lowering,
    # so it stays on the XLA side for now.
    xp = x.reshape(B, C, Hp, P, Wp, P)
    xp = jnp.transpose(xp, (0, 2, 4, 1, 3, 5))                  # (B, Hp, Wp, C, P, P)
    patches = xp.reshape(B * Hp * Wp, K).astype(compute_dtype)  # (M, K) bf16

    # Flattened conv weight with matching (c, ph, pw) K-ordering; tiny, cast to bf16.
    w_flat = conv_w.reshape(E, K).T.astype(compute_dtype)       # (K, E)
    bias = conv_b.astype(jnp.float32)

    # Lane-dense output: pad N (= embed_dim) up to a multiple of 128 with zero columns.
    n_pad = ((E + 127) // 128) * 128
    if n_pad != E:
        w_flat = jnp.pad(w_flat, ((0, 0), (0, n_pad - E)))
        bias = jnp.pad(bias, (0, n_pad - E))

    out = patch_embed_matmul(patches, w_flat, bias,
                             block_m=block_m, block_n=block_n,
                             out_dtype=x.dtype)                 # (M, n_pad)
    if n_pad != E:
        out = out[:, :E]
    return out.reshape(B, Hp, Wp, E)


if __name__ == "__main__":
    # Small shapes consistent with the module's forward (NCHW input).
    B, C, H, W = 2, 4, 16, 16
    patch_size = 4
    embed_dim = 32

    key = jax.random.PRNGKey(0)
    kx, kw, kb = jax.random.split(key, 3)
    x = jax.random.normal(kx, (B, C, H, W), dtype=jnp.float32)
    conv_w = jax.random.normal(kw, (embed_dim, C, patch_size, patch_size),
                               dtype=jnp.float32) * 0.02
    conv_b = jax.random.normal(kb, (embed_dim,), dtype=jnp.float32) * 0.02

    fn = jax.jit(patch_embed, static_argnums=(3,))
    out = jax.block_until_ready(fn(x, conv_w, conv_b, patch_size))

    # Reference: plain-JAX conv (NCHW, stride = kernel = patch_size) on the same
    # bf16-rounded inputs (the kernel computes bf16 x bf16 -> f32 on the MXU).
    xq = x.astype(jnp.bfloat16).astype(jnp.float32)
    wq = conv_w.astype(jnp.bfloat16).astype(jnp.float32)
    ref = lax.conv_general_dilated(
        xq, wq, window_strides=(patch_size, patch_size), padding="VALID",
        dimension_numbers=("NCHW", "OIHW", "NCHW"),
        precision=lax.Precision.HIGHEST,
    ) + conv_b[None, :, None, None]
    ref = jnp.transpose(ref, (0, 2, 3, 1))                      # b c h w -> b h w c

    assert out.shape == (B, H // patch_size, W // patch_size, embed_dim)
    assert jnp.allclose(out, ref, atol=1e-3, rtol=1e-3), float(jnp.max(jnp.abs(out - ref)))
    print("KERNEL_OK")
</pallas_src>

<mosaic_0001>
module attributes {stable_mosaic.version = 11 : i64} {
  func.func @_patch_embed_kernel(%arg0: i32, %arg1: i32, %arg2: memref<32x64xbf16, #tpu.memory_space<vmem>>, %arg3: memref<64x128xbf16, #tpu.memory_space<vmem>>, %arg4: memref<1x128xf32, #tpu.memory_space<vmem>>, %arg5: memref<32x128xf32, #tpu.memory_space<vmem>>) attributes {dimension_semantics = [#tpu.dimension_semantics<parallel>, #tpu.dimension_semantics<parallel>], iteration_bounds = array<i64: 1, 1>, scalar_prefetch = 0 : i64, scratch_operands = 0 : i64, tpu.core_type = #tpu.core_type<tc>, window_params = [{transform_indices = @transform_0, window_bounds = array<i64: 32, 64>}, {transform_indices = @transform_1, window_bounds = array<i64: 64, 128>}, {transform_indices = @transform_2, window_bounds = array<i64: 1, 128>}, {transform_indices = @transform_3, window_bounds = array<i64: 32, 128>}]} {
    %c0 = arith.constant 0 : index
    %c0_0 = arith.constant 0 : index
    %0 = vector.load %arg2[%c0, %c0_0] : memref<32x64xbf16, #tpu.memory_space<vmem>>, vector<32x64xbf16>
    %c0_1 = arith.constant 0 : index
    %c0_2 = arith.constant 0 : index
    %1 = vector.load %arg3[%c0_1, %c0_2] : memref<64x128xbf16, #tpu.memory_space<vmem>>, vector<64x128xbf16>
    %cst = arith.constant dense<0.000000e+00> : vector<32x128xf32>
    %2 = tpu.matmul %0, %1, %cst {dimension_numbers = #tpu.dot_dimension_numbers<[1], [0], [0], [1], [0, 0, 1, 1], [], []>} : vector<32x64xbf16>, vector<64x128xbf16>, vector<32x128xf32> -> vector<32x128xf32>
    %c0_3 = arith.constant 0 : index
    %c0_4 = arith.constant 0 : index
    %3 = vector.load %arg4[%c0_3, %c0_4] : memref<1x128xf32, #tpu.memory_space<vmem>>, vector<1x128xf32>
    %4 = vector.broadcast %3 : vector<1x128xf32> to vector<32x128xf32>
    %5 = arith.addf %2, %4 : vector<32x128xf32>
    %c0_5 = arith.constant 0 : index
    %c0_6 = arith.constant 0 : index
    %6 = vector.load %arg5[%c0_5, %c0_6] : memref<32x128xf32, #tpu.memory_space<vmem>>, vector<32x128xf32>
    tpu.vector_store %arg5[%c0_5, %c0_6], %5 {strides = array<i32>} : memref<32x128xf32, #tpu.memory_space<vmem>>, vector<32x128xf32>,
    return
  }
  func.func @transform_0(%arg0: i32, %arg1: i32) -> (i32, i32) {
    %c0_i32 = arith.constant 0 : i32
    %c0_i32_0 = arith.constant 0 : i32
    return %arg0, %c0_i32 : i32, i32
  }
  func.func @transform_1(%arg0: i32, %arg1: i32) -> (i32, i32) {
    %c0_i32 = arith.constant 0 : i32
    %c0_i32_0 = arith.constant 0 : i32
    return %c0_i32, %arg1 : i32, i32
  }
  func.func @transform_2(%arg0: i32, %arg1: i32) -> (i32, i32) {
    %c0_i32 = arith.constant 0 : i32
    %c0_i32_0 = arith.constant 0 : i32
    return %c0_i32, %arg1 : i32, i32
  }
  func.func @transform_3(%arg0: i32, %arg1: i32) -> (i32, i32) {
    %c0_i32 = arith.constant 0 : i32
    return %arg0, %arg1 : i32, i32
  }
}

</mosaic_0001>

<bundles_post_ra>
// kernel: patch_embed.1
= control target key start
LH: loop header
LB: loop body
LE: loop exit
PB: predicated region body
PF: predicated region fallthrough
CT: control target
= control target key end

     0   :  { %vm69_vm0 = vcmask 523264   ;;  %s261_s0 = inlined_call_operand.vmem [shape: bf16[32,64], index: 0, kind: input, shape index: {}]   ;;  %s262_s1 = inlined_call_operand.vmem [shape: bf16[64,128], index: 1, kind: input, shape index: {}]   ;;  %s263_s2 = inlined_call_operand.vmem [shape: f32[1,128], index: 2, kind: input, shape index: {}]   ;;  %s264_s3 = inlined_call_operand.hbm [shape: f32[32,128], index: 3, kind: output, shape index: {}]  }
   0x1   :  { %v175_v0 = vld [vmem:[%s262_s1] sm:$0xff]   ;;  %v176_v1 = vld [vmem:[%s262_s1 + $0x8] sm:$0xff]   ;;  %v177_v2 = vld [vmem:[%s262_s1 + $0x10] sm:$0xff]  }
   0x2   :  { %160 = vmatprep.subr.bf16.mxu0 %v175_v0  ;;  %v179_v3 = vld [vmem:[%s261_s0] sm:$0xff]  }
   0x3   :  { %161 = vmatpush3.bf16.msra.mxu0 %v175_v0  ;;  %168 = vmatprep.mubr.msk.bf16.mxu0 %vm69_vm0, %v179_v3 }
   0x4   :  { %162 = vmatprep.subr.bf16.mxu0 %v176_v1 }
   0x5   :  { %8 = vsyncpa [#allocation3], 0  ;;  %v178_v4 = vld [vmem:[%s262_s1 + $0x18] sm:$0xff]   ;;  %v180_v5 = vld [vmem:[%s261_s0 + $0x8] sm:$0xff]   ;;  %s205_s26 = smov [#allocation2]  }
   0x6   :  { %v145_v6 = vld [vmem:[%s263_s2] ss:$0 sm:$0xff]  ;;  %s134_s27 = sshll.u32 %s205_s26, 4  ;;  %s135_s27 = int_to_ptr.vmem [resolvable:$true] %s134_s27 }
   0x7   :  { %163 = vmatpush3.bf16.msra.mxu0 %v176_v1  ;;  %s181_s0 = scalar_lea.vmem %s135_s27, 512  ;;  %p186_p1 = scmp.lt.s32.totalorder %s135_s27, %s135_s27 }
   0x8   :  { %164 = vmatprep.subr.bf16.mxu0 %v177_v2  ;;  %p182_p0 = scmp.ne.s32.totalorder %s135_s27, %s181_s0  ;;  %p187_p2 = scmp.lt.s32.totalorder %s181_s0, %s181_s0 }
   0xa   :  { %p188_p3 = por %p187_p2, %p186_p1 }
   0xb   :  { %165 = vmatpush3.bf16.msra.mxu0 %v177_v2 }
   0xc   :  { %166 = vmatprep.subr.bf16.mxu0 %v178_v4  ;;  %p189_p4 = pnand %p188_p3, %p182_p0 }
   0xf   :  { %167 = vmatpush3.bf16.msra.mxu0 %v178_v4 }
  0x12   :  { %169 = vmatmul.mubr.msk.bf16.vlgmr.msra.gmra.mrb[0].mxu0 %vm69_vm0, %v180_v5 }
  0xe5   :  { %v170_v7 = vpop.f32.mrb[0].mxu0 }
  0xe6   :  { %v119_v8 = vadd.f32 %v170_v7, %v145_v6  ;;  %v110_v9 = vpop.f32.mrb[1].mxu0 }
  0xe7   :  { %v111_v10 = vadd.f32 %v145_v6, %v110_v9  ;;  %v171_v11 = vpop.f32.mrb[2].mxu0 }
  0xe8   :  { %127 = vst [vmem:[#allocation2 + $0x10] sm:$0xff] %v119_v8  ;;  %v122_v12 = vadd.f32 %v171_v11, %v145_v6  ;;  %v113_v13 = vpop.f32.mrb[3].mxu0 }
  0xe9   :  { %125 = vst [vmem:[#allocation2] sm:$0xff] %v111_v10  ;;  %v114_v14 = vadd.f32 %v145_v6, %v113_v13 }
  0xea   :  { %128 = vst [vmem:[#allocation2 + $0x18] sm:$0xff] %v122_v12 }
  0xeb   :  { %126 = vst [vmem:[#allocation2 + $0x8] sm:$0xff] %v114_v14 }
  0xec   :  { %192 = shalt.err (!%p189_p4)
}
  0xed   :  { %s193_s28 = scalar_lea.hbm %s264_s3, 512 }
  0xee   :  { %p194_p5 = scmp.ne.s32.totalorder %s264_s3, %s193_s28  ;;  %p197_p6 = scmp.lt.u32.totalorder %s193_s28, %s264_s3 }
  0xf0   :  { %p199_p7 = pnand %p197_p6, %p194_p5 }
  0xf2   :  { %202 = shalt.err (!%p199_p7)
}
  0xf3   :  { %s206_s6 = smov 128   ;;  %s207_s7 = smov 8  }
  0xf4   :  { %140 = dma.vmem_to_hbm [thread:$0]  %s135_s27, 512, %s264_s3, [#allocation3], %s206_s6, %s206_s6, %s207_s7  }
  0xf5   :  { %203 = dma.done.wait [#allocation3], 512  }
  0xf6   :  { %204 = vsyncadd [#allocation3], 4294966784 }
  0xf7   :  { %144 = vsyncpa [#allocation3], 1 }

</bundles_post_ra>
